<compile_context>
chip_gen: v7x
topology: tpu7x:2x2x1
jax: 0.10.0
libtpu: 0.0.40
codegen_flags: <defaults>
</compile_context>

<pallas_src>
import jax
import jax.numpy as jnp
from jax.experimental import pallas as pl
from jax.experimental.pallas import tpu as pltpu


# ---------------------------------------------------------------------------
# In-register lane helpers
# ---------------------------------------------------------------------------

def _roll_right(x, s):
    """out[..., i] = x[..., (i - s) % n]  (circular shift toward higher lanes)."""
    n = x.shape[-1]
    s = s % n
    if s == 0:
        return x
    if n % 128 == 0:
        # Single XLU lane rotate (same convention as np.roll / jnp.roll).
        return pltpu.roll(x, s, x.ndim - 1)
    # Sub-vreg lane widths (e.g. W=8 test shape): concat-of-slices still lowers
    # cleanly and these shapes are tiny anyway.
    return jnp.concatenate([x[..., n - s:], x[..., :n - s]], axis=-1)


def _stretch_plan(w):
    """Static plan for the lane-spread network.

    Returns (wp, stages, odd_mask): `stages` is a list of (shift, (1, n) bool
    mask) pairs built once from a (1, n) iota so they are hoisted out of the
    per-chunk compute loop (the broadcast happens inside the select).
    """
    wp = 1
    while wp < w:
        wp *= 2
    n = 2 * wp
    lane = jax.lax.broadcasted_iota(jnp.int32, (1, n), 1)
    stages = []
    t = 0
    while (wp >> t) > 1:
        blk = n >> t
        shift = wp >> (t + 1)
        off = lane & (blk - 1)
        mask = (off >= (blk >> 1)) & (off < (blk >> 1) + shift)
        stages.append((shift, mask))
        t += 1
    odd_mask = (lane & 1) == 1
    return wp, stages, odd_mask


def _apply_stretch(v, w, wp, stages, odd_mask):
    """(rows, w) -> (rows, 2w) with out[:, 2m] == out[:, 2m+1] == v[:, m]."""
    rows = v.shape[0]
    if wp != w:  # pad lanes up to a power of two (padding is never read back)
        v = jnp.concatenate([v, jnp.zeros((rows, wp - w), v.dtype)], axis=-1)
    z = jnp.concatenate([v, v], axis=-1)                     # (rows, 2*wp)
    # Invariant after stage t: every block of size (2*wp) >> t holds, in its
    # first (wp >> t) lanes, the corresponding contiguous chunk of v.
    for shift, mask in stages:
        z = jnp.where(mask, _roll_right(z, shift), z)
    # Now z[:, 2m] == v[:, m]; duplicate into the odd lanes.
    z = jnp.where(odd_mask, _roll_right(z, 1), z)
    return z[:, : 2 * w]


# ---------------------------------------------------------------------------
# Kernel
# ---------------------------------------------------------------------------

def _make_iwt_kernel(w, chunk, n_chunks):
    """x block: (1, 4, R, W) sub-bands; o block: (1, R, 4W) final rows."""

    def kernel(x_ref, o_ref):
        f32 = jnp.float32
        # Hoisted per-trace constants (tiny (1, n) arrays, reused by every chunk).
        wp, stages, odd_mask = _stretch_plan(w)
        lane = jax.lax.broadcasted_iota(jnp.int32, (1, 2 * w), 1)
        sgn_half = jnp.where((lane & 1) == 0, f32(-0.5), f32(0.5))

        def do_chunk(r0):
            x1 = x_ref[0, 0, pl.ds(r0, chunk), :].astype(f32)
            x2 = x_ref[0, 1, pl.ds(r0, chunk), :].astype(f32)
            x3 = x_ref[0, 2, pl.ds(r0, chunk), :].astype(f32)
            x4 = x_ref[0, 3, pl.ds(r0, chunk), :].astype(f32)

            # Even output rows: even cols = x1-x2-x3+x4, odd cols = x1+x2-x3-x4
            #                   = (x1-x3) -/+ (x2-x4)
            # Odd output rows:  even cols = x1-x2+x3-x4, odd cols = x1+x2+x3+x4
            #                   = (x1+x3) -/+ (x2+x4)
            stacked = jnp.concatenate(
                [x1 - x3, x2 - x4, x1 + x3, x2 + x4], axis=0)        # (4c, W)
            st = _apply_stretch(stacked, w, wp, stages, odd_mask)    # (4c, 2W)
            p_e = st[0 * chunk:1 * chunk]
            q_e = st[1 * chunk:2 * chunk]
            p_o = st[2 * chunk:3 * chunk]
            q_o = st[3 * chunk:4 * chunk]

            # 0.5 of the reference folded into the combine constants.
            even = 0.5 * p_e + sgn_half * q_e                        # (c, 2W)
            odd = 0.5 * p_o + sgn_half * q_o                         # (c, 2W)

            # [even row | odd row] is exactly the contiguous memory order of the
            # two output rows generated by one input row; store halves directly.
            o_ref[0, pl.ds(r0, chunk), pl.ds(0, 2 * w)] = even.astype(o_ref.dtype)
            o_ref[0, pl.ds(r0, chunk), pl.ds(2 * w, 2 * w)] = odd.astype(o_ref.dtype)

        if n_chunks == 1:
            do_chunk(0)
        else:
            def body(c, carry):
                do_chunk(pl.multiple_of(c * chunk, chunk))
                return carry
            jax.lax.fori_loop(0, n_chunks, body, 0, unroll=(n_chunks <= 4))

    return kernel


# ---------------------------------------------------------------------------
# Tiling heuristics + wrapper
# ---------------------------------------------------------------------------

def _choose_tiles(S, W, B):
    # Per source row (f32): 4 sub-band rows in (16*W B) + one 4W output row
    # (16*W B) = 32*W bytes.  Target ~4 MiB of in+out per grid step so the
    # double-buffered working set is ~8 MiB (well inside v7x's 64 MiB VMEM)
    # while amortising the ~0.35us per-grid-step overhead.
    bytes_per_row = 32 * W
    target = max(8, (4 * 1024 * 1024) // bytes_per_row)
    target = max(8, (target // 8) * 8)
    r_blk = S if S <= target else target

    # v7x has 2 TensorCores: keep >=2 grid steps on the parallel axes even for
    # batch-1 inputs so work can be sharded across them.
    if B == 1 and r_blk == S and S >= 64:
        half = (((S + 1) // 2) + 7) // 8 * 8
        r_blk = min(half, S)

    # Rows per in-kernel compute chunk: keep the spread network's working set
    # (~4*chunk x 2*Wp f32) around the 64-vreg file so stages stay in-register.
    wp = 1
    while wp < max(W, 1):
        wp *= 2
    pref = max(8, min(32, ((8192 // wp) // 8) * 8)) if wp <= 8192 else 8
    chunk = r_blk
    for c in (pref, 32, 16, 8):
        if 0 < c <= r_blk and r_blk % c == 0:
            chunk = c
            break
    return r_blk, chunk


def _iwt_impl(x, *, row_block=None, chunk_rows=None):
    """Inverse wavelet transform. x: (B, 4C, H, W) -> (B, C, 2H, 2W) float32."""
    B, C4, H, W = x.shape
    if C4 % 4 != 0:
        raise ValueError("channel count must be divisible by 4")
    C = C4 // 4
    S = C * H

    r_blk, chunk = _choose_tiles(S, W, B)
    if row_block is not None:
        r_blk = int(row_block)
    if chunk_rows is not None:
        chunk = int(chunk_rows)
    if r_blk % chunk != 0:
        chunk = r_blk
    n_chunks = r_blk // chunk
    n_row_tiles = pl.cdiv(S, r_blk)   # ragged last tile: OOB writes are clipped

    xr = x.reshape(B, 4, S, W)        # free view of the contiguous NCHW input

    out = pl.pallas_call(
        _make_iwt_kernel(W, chunk, n_chunks),
        out_shape=jax.ShapeDtypeStruct((B, S, 4 * W), jnp.float32),
        grid=(B, n_row_tiles),
        in_specs=[pl.BlockSpec((1, 4, r_blk, W), lambda b, s: (b, 0, s, 0))],
        out_specs=pl.BlockSpec((1, r_blk, 4 * W), lambda b, s: (b, s, 0)),
        compiler_params=pltpu.CompilerParams(
            dimension_semantics=("parallel", "parallel"),
            vmem_limit_bytes=32 * 1024 * 1024,
        ),
    )(xr)

    # (B, C*H, 4W) has exactly the bytes of (B, C, 2H, 2W): free bitcast reshape.
    return out.reshape(B, C, 2 * H, 2 * W)


iwt = jax.jit(_iwt_impl, static_argnames=("row_block", "chunk_rows"))


def iwt_reference(x):
    """Pure-JAX reference mirroring the PyTorch forward exactly."""
    B, C4, H, W = x.shape
    C = C4 // 4
    x = x.astype(jnp.float32)
    x1 = x[:, 0:C] / 2
    x2 = x[:, C:2 * C] / 2
    x3 = x[:, 2 * C:3 * C] / 2
    x4 = x[:, 3 * C:4 * C] / 2
    h = jnp.zeros((B, C, 2 * H, 2 * W), jnp.float32)
    h = h.at[:, :, 0::2, 0::2].set(x1 - x2 - x3 + x4)
    h = h.at[:, :, 1::2, 0::2].set(x1 - x2 + x3 - x4)
    h = h.at[:, :, 0::2, 1::2].set(x1 + x2 - x3 - x4)
    h = h.at[:, :, 1::2, 1::2].set(x1 + x2 + x3 + x4)
    return h


if __name__ == "__main__":
    key = jax.random.PRNGKey(0)
    k1, k2 = jax.random.split(key)

    # Case 1: module-default small shape (W=8 < 32: sub-vreg lane path,
    # single row tile, single in-kernel chunk).
    x1 = jax.random.normal(k1, (2, 16, 8, 8), dtype=jnp.float32)
    h1 = jax.block_until_ready(iwt(x1))
    r1 = iwt_reference(x1)
    assert h1.shape == (2, 4, 16, 16) and h1.dtype == jnp.float32
    # In-kernel arithmetic is re-associated as 0.5*(x1+/-x3) -/+ 0.5*(x2+/-x4),
    # so allow a few f32 ulps vs the literal PyTorch ordering.
    assert float(jnp.max(jnp.abs(h1 - r1))) < 1e-5

    # Case 2: lane width 64 (exercises the pltpu.roll path) with default tiling
    # (multi-chunk fori_loop inside a single row tile).
    x2 = jax.random.normal(k2, (2, 8, 20, 64), dtype=jnp.float32)
    h2 = jax.block_until_ready(iwt(x2))
    r2 = iwt_reference(x2)
    assert h2.shape == (2, 2, 40, 128) and h2.dtype == jnp.float32
    assert float(jnp.max(jnp.abs(h2 - r2))) < 1e-5

    # Same input with an explicit small row block: exercises the cdiv grid with
    # a ragged last row tile and multiple grid steps per parallel axis.
    h3 = jax.block_until_ready(iwt(x2, row_block=16, chunk_rows=8))
    assert float(jnp.max(jnp.abs(h3 - r2))) < 1e-5

    print("KERNEL_OK")
</pallas_src>

<mosaic_0001>
module attributes {stable_mosaic.version = 11 : i64} {
  func.func @kernel(%arg0: i32, %arg1: i32, %arg2: memref<1x4x32x8xf32, #tpu.memory_space<vmem>>, %arg3: memref<1x32x32xf32, #tpu.memory_space<vmem>>) attributes {dimension_semantics = [#tpu.dimension_semantics<parallel>, #tpu.dimension_semantics<parallel>], iteration_bounds = array<i64: 2, 1>, scalar_prefetch = 0 : i64, scratch_operands = 0 : i64, tpu.core_type = #tpu.core_type<tc>, window_params = [{transform_indices = @transform_0, window_bounds = array<i64: 1, 4, 32, 8>}, {transform_indices = @transform_1, window_bounds = array<i64: 1, 32, 32>}]} {
    %0 = tpu.iota {dimensions = array<i32: 1>} : vector<1x16xi32>
    %c15_i32 = arith.constant 15 : i32
    %1 = vector.broadcast %c15_i32 : i32 to vector<1x16xi32>
    %2 = arith.andi %0, %1 : vector<1x16xi32>
    %c8_i32 = arith.constant 8 : i32
    %3 = vector.broadcast %c8_i32 : i32 to vector<1x16xi32>
    %4 = arith.cmpi sge, %2, %3 : vector<1x16xi32>
    %c12_i32 = arith.constant 12 : i32
    %5 = vector.broadcast %c12_i32 : i32 to vector<1x16xi32>
    %6 = arith.cmpi slt, %2, %5 : vector<1x16xi32>
    %7 = arith.andi %4, %6 : vector<1x16xi1>
    %c7_i32 = arith.constant 7 : i32
    %8 = vector.broadcast %c7_i32 : i32 to vector<1x16xi32>
    %9 = arith.andi %0, %8 : vector<1x16xi32>
    %c4_i32 = arith.constant 4 : i32
    %10 = vector.broadcast %c4_i32 : i32 to vector<1x16xi32>
    %11 = arith.cmpi sge, %9, %10 : vector<1x16xi32>
    %c6_i32 = arith.constant 6 : i32
    %12 = vector.broadcast %c6_i32 : i32 to vector<1x16xi32>
    %13 = arith.cmpi slt, %9, %12 : vector<1x16xi32>
    %14 = arith.andi %11, %13 : vector<1x16xi1>
    %c3_i32 = arith.constant 3 : i32
    %15 = vector.broadcast %c3_i32 : i32 to vector<1x16xi32>
    %16 = arith.andi %0, %15 : vector<1x16xi32>
    %c2_i32 = arith.constant 2 : i32
    %17 = vector.broadcast %c2_i32 : i32 to vector<1x16xi32>
    %18 = arith.cmpi sge, %16, %17 : vector<1x16xi32>
    %c3_i32_0 = arith.constant 3 : i32
    %19 = vector.broadcast %c3_i32_0 : i32 to vector<1x16xi32>
    %20 = arith.cmpi slt, %16, %19 : vector<1x16xi32>
    %21 = arith.andi %18, %20 : vector<1x16xi1>
    %c1_i32 = arith.constant 1 : i32
    %22 = vector.broadcast %c1_i32 : i32 to vector<1x16xi32>
    %23 = arith.andi %0, %22 : vector<1x16xi32>
    %c1_i32_1 = arith.constant 1 : i32
    %24 = vector.broadcast %c1_i32_1 : i32 to vector<1x16xi32>
    %25 = arith.cmpi eq, %23, %24 : vector<1x16xi32>
    %26 = tpu.iota {dimensions = array<i32: 1>} : vector<1x16xi32>
    %c1_i32_2 = arith.constant 1 : i32
    %27 = vector.broadcast %c1_i32_2 : i32 to vector<1x16xi32>
    %28 = arith.andi %26, %27 : vector<1x16xi32>
    %c0_i32 = arith.constant 0 : i32
    %29 = vector.broadcast %c0_i32 : i32 to vector<1x16xi32>
    %30 = arith.cmpi eq, %28, %29 : vector<1x16xi32>
    %cst = arith.constant -5.000000e-01 : f32
    %cst_3 = arith.constant 5.000000e-01 : f32
    %31 = vector.broadcast %cst : f32 to vector<1x16xf32>
    %32 = vector.broadcast %cst_3 : f32 to vector<1x16xf32>
    %33 = arith.select %30, %31, %32 : vector<1x16xi1>, vector<1x16xf32>
    %c0 = arith.constant 0 : index
    %c0_4 = arith.constant 0 : index
    %c0_5 = arith.constant 0 : index
    %c0_6 = arith.constant 0 : index
    %34 = vector.load %arg2[%c0, %c0_4, %c0_5, %c0_6] : memref<1x4x32x8xf32, #tpu.memory_space<vmem>>, vector<1x1x32x8xf32>
    %35 = vector.shape_cast %34 : vector<1x1x32x8xf32> to vector<32x8xf32>
    %c0_7 = arith.constant 0 : index
    %c1 = arith.constant 1 : index
    %c0_8 = arith.constant 0 : index
    %c0_9 = arith.constant 0 : index
    %36 = vector.load %arg2[%c0_7, %c1, %c0_8, %c0_9] : memref<1x4x32x8xf32, #tpu.memory_space<vmem>>, vector<1x1x32x8xf32>
    %37 = vector.shape_cast %36 : vector<1x1x32x8xf32> to vector<32x8xf32>
    %c0_10 = arith.constant 0 : index
    %c2 = arith.constant 2 : index
    %c0_11 = arith.constant 0 : index
    %c0_12 = arith.constant 0 : index
    %38 = vector.load %arg2[%c0_10, %c2, %c0_11, %c0_12] : memref<1x4x32x8xf32, #tpu.memory_space<vmem>>, vector<1x1x32x8xf32>
    %39 = vector.shape_cast %38 : vector<1x1x32x8xf32> to vector<32x8xf32>
    %c0_13 = arith.constant 0 : index
    %c3 = arith.constant 3 : index
    %c0_14 = arith.constant 0 : index
    %c0_15 = arith.constant 0 : index
    %40 = vector.load %arg2[%c0_13, %c3, %c0_14, %c0_15] : memref<1x4x32x8xf32, #tpu.memory_space<vmem>>, vector<1x1x32x8xf32>
    %41 = vector.shape_cast %40 : vector<1x1x32x8xf32> to vector<32x8xf32>
    %42 = arith.subf %35, %39 : vector<32x8xf32>
    %43 = arith.subf %37, %41 : vector<32x8xf32>
    %44 = arith.addf %35, %39 : vector<32x8xf32>
    %45 = arith.addf %37, %41 : vector<32x8xf32>
    %46 = tpu.concatenate %42, %43, %44, %45 in 0 : vector<32x8xf32>, vector<32x8xf32>, vector<32x8xf32>, vector<32x8xf32> -> vector<128x8xf32>
    %47 = tpu.concatenate %46, %46 in 1 : vector<128x8xf32>, vector<128x8xf32> -> vector<128x16xf32>
    %48 = vector.extract_strided_slice %47 {offsets = [0, 12], sizes = [128, 4], strides = [1, 1]} : vector<128x16xf32> to vector<128x4xf32>
    %49 = vector.extract_strided_slice %47 {offsets = [0, 0], sizes = [128, 12], strides = [1, 1]} : vector<128x16xf32> to vector<128x12xf32>
    %50 = tpu.concatenate %48, %49 in 1 : vector<128x4xf32>, vector<128x12xf32> -> vector<128x16xf32>
    %51 = vector.shape_cast %7 : vector<1x16xi1> to vector<1x16xi1>
    %52 = vector.broadcast %51 : vector<1x16xi1> to vector<128x16xi1>
    %53 = arith.select %52, %50, %47 : vector<128x16xi1>, vector<128x16xf32>
    %54 = vector.extract_strided_slice %53 {offsets = [0, 14], sizes = [128, 2], strides = [1, 1]} : vector<128x16xf32> to vector<128x2xf32>
    %55 = vector.extract_strided_slice %53 {offsets = [0, 0], sizes = [128, 14], strides = [1, 1]} : vector<128x16xf32> to vector<128x14xf32>
    %56 = tpu.concatenate %54, %55 in 1 : vector<128x2xf32>, vector<128x14xf32> -> vector<128x16xf32>
    %57 = vector.shape_cast %14 : vector<1x16xi1> to vector<1x16xi1>
    %58 = vector.broadcast %57 : vector<1x16xi1> to vector<128x16xi1>
    %59 = arith.select %58, %56, %53 : vector<128x16xi1>, vector<128x16xf32>
    %60 = vector.extract_strided_slice %59 {offsets = [0, 15], sizes = [128, 1], strides = [1, 1]} : vector<128x16xf32> to vector<128x1xf32>
    %61 = vector.extract_strided_slice %59 {offsets = [0, 0], sizes = [128, 15], strides = [1, 1]} : vector<128x16xf32> to vector<128x15xf32>
    %62 = tpu.concatenate %60, %61 in 1 : vector<128x1xf32>, vector<128x15xf32> -> vector<128x16xf32>
    %63 = vector.shape_cast %21 : vector<1x16xi1> to vector<1x16xi1>
    %64 = vector.broadcast %63 : vector<1x16xi1> to vector<128x16xi1>
    %65 = arith.select %64, %62, %59 : vector<128x16xi1>, vector<128x16xf32>
    %66 = vector.extract_strided_slice %65 {offsets = [0, 15], sizes = [128, 1], strides = [1, 1]} : vector<128x16xf32> to vector<128x1xf32>
    %67 = vector.extract_strided_slice %65 {offsets = [0, 0], sizes = [128, 15], strides = [1, 1]} : vector<128x16xf32> to vector<128x15xf32>
    %68 = tpu.concatenate %66, %67 in 1 : vector<128x1xf32>, vector<128x15xf32> -> vector<128x16xf32>
    %69 = vector.shape_cast %25 : vector<1x16xi1> to vector<1x16xi1>
    %70 = vector.broadcast %69 : vector<1x16xi1> to vector<128x16xi1>
    %71 = arith.select %70, %68, %65 : vector<128x16xi1>, vector<128x16xf32>
    %72 = vector.extract_strided_slice %71 {offsets = [0, 0], sizes = [32, 16], strides = [1, 1]} : vector<128x16xf32> to vector<32x16xf32>
    %73 = vector.extract_strided_slice %71 {offsets = [32, 0], sizes = [32, 16], strides = [1, 1]} : vector<128x16xf32> to vector<32x16xf32>
    %74 = vector.extract_strided_slice %71 {offsets = [64, 0], sizes = [32, 16], strides = [1, 1]} : vector<128x16xf32> to vector<32x16xf32>
    %75 = vector.extract_strided_slice %71 {offsets = [96, 0], sizes = [32, 16], strides = [1, 1]} : vector<128x16xf32> to vector<32x16xf32>
    %cst_16 = arith.constant 5.000000e-01 : f32
    %76 = vector.broadcast %cst_16 : f32 to vector<32x16xf32>
    %77 = arith.mulf %76, %72 : vector<32x16xf32>
    %78 = vector.broadcast %33 : vector<1x16xf32> to vector<32x16xf32>
    %79 = arith.mulf %78, %73 : vector<32x16xf32>
    %80 = arith.addf %77, %79 : vector<32x16xf32>
    %cst_17 = arith.constant 5.000000e-01 : f32
    %81 = vector.broadcast %cst_17 : f32 to vector<32x16xf32>
    %82 = arith.mulf %81, %74 : vector<32x16xf32>
    %83 = vector.broadcast %33 : vector<1x16xf32> to vector<32x16xf32>
    %84 = arith.mulf %83, %75 : vector<32x16xf32>
    %85 = arith.addf %82, %84 : vector<32x16xf32>
    %c0_18 = arith.constant 0 : index
    %c0_19 = arith.constant 0 : index
    %c0_20 = arith.constant 0 : index
    %86 = vector.load %arg3[%c0_18, %c0_19, %c0_20] : memref<1x32x32xf32, #tpu.memory_space<vmem>>, vector<1x32x16xf32>
    %87 = vector.shape_cast %86 : vector<1x32x16xf32> to vector<32x16xf32>
    %88 = vector.shape_cast %80 : vector<32x16xf32> to vector<1x32x16xf32>
    tpu.vector_store %arg3[%c0_18, %c0_19, %c0_20], %88 {strides = array<i32>} : memref<1x32x32xf32, #tpu.memory_space<vmem>>, vector<1x32x16xf32>,
    %c0_21 = arith.constant 0 : index
    %c0_22 = arith.constant 0 : index
    %c16 = arith.constant 16 : index
    %89 = vector.load %arg3[%c0_21, %c0_22, %c16] : memref<1x32x32xf32, #tpu.memory_space<vmem>>, vector<1x32x16xf32>
    %90 = vector.shape_cast %89 : vector<1x32x16xf32> to vector<32x16xf32>
    %91 = vector.shape_cast %85 : vector<32x16xf32> to vector<1x32x16xf32>
    tpu.vector_store %arg3[%c0_21, %c0_22, %c16], %91 {strides = array<i32>} : memref<1x32x32xf32, #tpu.memory_space<vmem>>, vector<1x32x16xf32>,
    return
  }
  func.func @transform_0(%arg0: i32, %arg1: i32) -> (i32, i32, i32, i32) {
    %c0_i32 = arith.constant 0 : i32
    %c0_i32_0 = arith.constant 0 : i32
    %c0_i32_1 = arith.constant 0 : i32
    return %arg0, %c0_i32, %arg1, %c0_i32_0 : i32, i32, i32, i32
  }
  func.func @transform_1(%arg0: i32, %arg1: i32) -> (i32, i32, i32) {
    %c0_i32 = arith.constant 0 : i32
    %c0_i32_0 = arith.constant 0 : i32
    return %arg0, %arg1, %c0_i32 : i32, i32, i32
  }
}

</mosaic_0001>

<bundles_post_ra>
// kernel: _iwt_impl.1
= control target key start
LH: loop header
LB: loop body
LE: loop exit
PB: predicated region body
PF: predicated region fallthrough
CT: control target
= control target key end

     0   :  { %s1115_s6 = smov 0   ;;  %s1117_s7 = smov 0   ;;  %s1870_s0 = inlined_call_operand.vmem [shape: f32[2,4,32,8], index: 0, kind: input, shape index: {}]   ;;  %s1871_s1 = inlined_call_operand.vmem [shape: f32[2,32,32], index: 1, kind: output, shape index: {}]  }
   0x1   :  { %s1119_s8 = smov 0  }
   0x2 LB: > { %s23_s9 = sadd.s32 1, %s1090_s7  ;;  %p1018_p0 = scmp.ge.s32.totalorder %s1094_s8, 1  ;;  %s1094_s8 = sphi %s1119_s8, %s11_s8   ;;  %s1090_s7 = sphi %s1117_s7, %s1881_s7   ;;  %s1086_s6 = sphi %s1115_s6, %s1880_s6  }
   0x3   : > { %p25_p1 = scmp.ge.s32.totalorder %s23_s9, 2  ;;  %p108_p2 = scmp.lt.s32.totalorder %s1094_s8, 3 }
   0x5   : > { %s1883_s9 = smov (%p25_p1, %s23_s9), 0  ;;  %p109_p3 = pnand %p1018_p0, %p108_p2 }
   0x6   : > { %p137_p4 = scmp.lt.s32.totalorder (!%p109_p3), %s1086_s6, 1  ;;  %s1096_s14 = smov (!%p109_p3), 8   ;;  %vm273_vm0 = vcmask (!%p109_p3), 64512   ;;  %vm402_vm3 = vcmask (!%p109_p3), 31744   ;;  %vm549_vm7 = vcmask (!%p109_p3), 15360   ;;  %vm696_vm11 = vcmask (!%p109_p3), 7168  }
   0x7   : > { %112 = sbr.rel (%p109_p3) target bundleno = 805 (0x325), region = 24  ;;  %s1097_s15 = smov (!%p109_p3), 116   ;;  %vm901_vm15 = vcmask (!%p109_p3), 130048  }
   0x8   : > { %s1098_s16 = smov (!%p109_p3), 4   ;;  %s1099_s17 = smov (!%p109_p3), 114  }
   0x9   : > { %s1100_s18 = smov (!%p109_p3), 2   ;;  %s1101_s19 = smov (!%p109_p3), 113  }
   0xa   : > { %s1102_s20 = smov (!%p109_p3), 1   ;;  %s1104_s21 = smov (!%p109_p3), 16  }
   0xe   : > { %s1885_s6 = smov (!%p137_p4, %s1086_s6), 1 }
   0xf   : > { %s1037_s10 = sshll.u32 %s1885_s6, 7  ;;  %s1038_s22 = sshll.u32 %s1885_s6, 5 }
  0x10   : > { %s144_s13 = scalar_lea.vmem %s1870_s0, %s1037_s10  ;;  %s1828_s25 = scalar_lea.vmem %s1871_s1, %s1038_s22 }
  0x11   : > { %v174_v0 = vld [vmem:[%s144_s13] sm:$0xff]  ;;  %v176_v2 = vld [vmem:[%s144_s13 + $0x10] sm:$0xff]  ;;  %v175_v5 = vld [vmem:[%s144_s13 + $0x8] sm:$0xff] }
  0x12   : > { %v1027_v1 = vld [vmem:[%s144_s13 + $0x40] sm:$0xff]  ;;  %v1029_v4 = vld [vmem:[%s144_s13 + $0x50] sm:$0xff]  ;;  %v1028_v6 = vld [vmem:[%s144_s13 + $0x48] sm:$0xff] }
  0x13   : > { %v201_v3 = vadd.f32 %v1027_v1, %v174_v0  ;;  %v203_v7 = vadd.f32 %v1029_v4, %v176_v2  ;;  %v177_v8 = vld [vmem:[%s144_s13 + $0x18] sm:$0xff]  ;;  %v202_v10 = vadd.f32 %v1028_v6, %v175_v5  ;;  %v1023_v12 = vld [vmem:[%s144_s13 + $0x20] sm:$0xff]  ;;  %v1024_v14 = vld [vmem:[%s144_s13 + $0x28] sm:$0xff]  ;;  %v193_v24 = vsub.f32 %v174_v0, %v1027_v1 }
  0x14   : > { %v1030_v9 = vld [vmem:[%s144_s13 + $0x58] sm:$0xff]  ;;  %v1031_v13 = vld [vmem:[%s144_s13 + $0x60] sm:$0xff]  ;;  %v1032_v15 = vld [vmem:[%s144_s13 + $0x68] sm:$0xff]  ;;  %v194_v25 = vsub.f32 %v175_v5, %v1028_v6  ;;  %v195_v26 = vsub.f32 %v176_v2, %v1029_v4  ;;  %v156_v1 = vlaneseq }
  0x15   : > { %241 = vrot.lane.b32.xlu0 %v201_v3, %s1096_s14  ;;  %245 = vrot.lane.b32.xlu1 %v203_v7, %s1096_s14  ;;  %v204_v11 = vadd.f32 %v1030_v9, %v177_v8  ;;  %v205_v16 = vadd.f32 %v1031_v13, %v1023_v12  ;;  %v206_v17 = vadd.f32 %v1032_v15, %v1024_v14  ;;  %v1025_v18 = vld [vmem:[%s144_s13 + $0x30] sm:$0xff]  ;;  %v1026_v20 = vld [vmem:[%s144_s13 + $0x38] sm:$0xff] }
  0x16   : > { %v1033_v19 = vld [vmem:[%s144_s13 + $0x70] sm:$0xff]  ;;  %v1034_v21 = vld [vmem:[%s144_s13 + $0x78] sm:$0xff]  ;;  %v196_v27 = vsub.f32 %v177_v8, %v1030_v9  ;;  %v197_v28 = vsub.f32 %v1023_v12, %v1031_v13  ;;  %v198_v29 = vsub.f32 %v1024_v14, %v1032_v15  ;;  %v1267_v4 = vand.u32 127, %v156_v1 }
  0x17   : > { %v207_v22 = vadd.f32 %v1033_v19, %v1025_v18  ;;  %v208_v23 = vadd.f32 %v1034_v21, %v1026_v20  ;;  %v199_v30 = vsub.f32 %v1025_v18, %v1033_v19  ;;  %v200_v31 = vsub.f32 %v1026_v20, %v1034_v21 }
  0x19   : > { %243 = vrot.lane.b32.xlu0 %v202_v10, %s1096_s14  ;;  %247 = vrot.lane.b32.xlu1 %v204_v11, %s1096_s14 }
  0x1d   : > { %249 = vrot.lane.b32.xlu0 %v205_v16, %s1096_s14  ;;  %251 = vrot.lane.b32.xlu1 %v206_v17, %s1096_s14 }
  0x21   : > { %253 = vrot.lane.b32.xlu0 %v207_v22, %s1096_s14  ;;  %255 = vrot.lane.b32.xlu1 %v208_v23, %s1096_s14 }
  0x25   : > { %225 = vrot.lane.b32.xlu0 %v193_v24, %s1096_s14  ;;  %227 = vrot.lane.b32.xlu1 %v194_v25, %s1096_s14 }
  0x29   : > { %229 = vrot.lane.b32.xlu0 %v195_v26, %s1096_s14  ;;  %231 = vrot.lane.b32.xlu1 %v196_v27, %s1096_s14 }
  0x2d   : > { %233 = vrot.lane.b32.xlu0 %v197_v28, %s1096_s14  ;;  %235 = vrot.lane.b32.xlu1 %v198_v29, %s1096_s14 }
  0x31   : > { %237 = vrot.lane.b32.xlu0 %v199_v30, %s1096_s14  ;;  %239 = vrot.lane.b32.xlu1 %v200_v31, %s1096_s14 }
  0x87   : > { %v242_v32 = vpop.permute.xlu0 %241  ;;  %v246_v34 = vpop.permute.xlu1 %245 }
  0x88   : > { %v1156_v33 = vsel %vm273_vm0, %v201_v3, %v242_v32  ;;  %v1161_v35 = vsel %vm273_vm0, %v203_v7, %v246_v34  ;;  %v158_v7 = vand.u32 15, %v1267_v4 }
  0x89   : > { %322 = vrot.lane.b32.xlu0 %v1156_v33, %s1097_s15 }
  0x8a   : > { %vm159_vm1 = vcmp.ge.s32.totalorder %v158_v7, 8  ;;  %vm160_vm2 = vcmp.lt.s32.totalorder %v158_v7, 12 }
  0x8b   : > { %v244_v36 = vpop.permute.xlu0 %243  ;;  %v248_v38 = vpop.permute.xlu1 %247  ;;  %vm1270_vm4 = vmand %vm159_vm1, %vm160_vm2 }
  0x8c   : > { %v1164_v37 = vsel %vm273_vm0, %v202_v10, %v244_v36  ;;  %v1171_v39 = vsel %vm273_vm0, %v204_v11, %v248_v38  ;;  %v162_v10 = vand.u32 7, %v1267_v4 }
  0x8d   : > { %324 = vrot.lane.b32.xlu1 %v1164_v37, %s1097_s15  ;;  %326 = vrot.lane.b32.xlu0 %v1161_v35, %s1097_s15 }
  0x8e   : > { %vm163_vm5 = vcmp.ge.s32.totalorder %v162_v10, 4  ;;  %vm164_vm6 = vcmp.lt.s32.totalorder %v162_v10, 6 }
  0x8f   : > { %v250_v40 = vpop.permute.xlu0 %249  ;;  %v252_v42 = vpop.permute.xlu1 %251  ;;  %vm1435_vm8 = vmand %vm163_vm5, %vm164_vm6 }
  0x90   : > { %v1174_v41 = vsel %vm273_vm0, %v205_v16, %v250_v40  ;;  %v1181_v43 = vsel %vm273_vm0, %v206_v17, %v252_v42 }
  0x91   : > { %328 = vrot.lane.b32.xlu1 %v1171_v39, %s1097_s15  ;;  %330 = vrot.lane.b32.xlu0 %v1174_v41, %s1097_s15 }
  0x93   : > { %v254_v44 = vpop.permute.xlu0 %253  ;;  %v256_v46 = vpop.permute.xlu1 %255 }
  0x94   : > { %v1184_v45 = vsel %vm273_vm0, %v207_v22, %v254_v44  ;;  %v1191_v47 = vsel %vm273_vm0, %v208_v23, %v256_v46 }
  0x95   : > { %332 = vrot.lane.b32.xlu1 %v1181_v43, %s1097_s15  ;;  %334 = vrot.lane.b32.xlu0 %v1184_v45, %s1097_s15 }
  0x97   : > { %v226_v48 = vpop.permute.xlu0 %225  ;;  %v228_v49 = vpop.permute.xlu1 %227 }
  0x98   : > { %v1210_v51 = vsel %vm273_vm0, %v193_v24, %v226_v48  ;;  %v1217_v54 = vsel %vm273_vm0, %v194_v25, %v228_v49 }
  0x99   : > { %336 = vrot.lane.b32.xlu1 %v1191_v47, %s1097_s15  ;;  %370 = vrot.lane.b32.xlu0 %v1156_v33, %s1098_s16 }
  0x9b   : > { %v230_v50 = vpop.permute.xlu0 %229  ;;  %v232_v52 = vpop.permute.xlu1 %231 }
  0x9c   : > { %v1220_v55 = vsel %vm273_vm0, %v195_v26, %v230_v50  ;;  %v1227_v57 = vsel %vm273_vm0, %v196_v27, %v232_v52 }
  0x9d   : > { %372 = vrot.lane.b32.xlu1 %v1164_v37, %s1098_s16  ;;  %374 = vrot.lane.b32.xlu0 %v1161_v35, %s1098_s16 }
  0x9f   : > { %v234_v53 = vpop.permute.xlu0 %233  ;;  %v236_v56 = vpop.permute.xlu1 %235 }
  0xa0   : > { %v1230_v58 = vsel %vm273_vm0, %v197_v28, %v234_v53  ;;  %v1237_v60 = vsel %vm273_vm0, %v198_v29, %v236_v56 }
  0xa1   : > { %376 = vrot.lane.b32.xlu1 %v1171_v39, %s1098_s16  ;;  %378 = vrot.lane.b32.xlu0 %v1174_v41, %s1098_s16 }
  0xa3   : > { %v238_v59 = vpop.permute.xlu0 %237  ;;  %v240_v62 = vpop.permute.xlu1 %239 }
  0xa4   : > { %v1240_v61 = vsel %vm273_vm0, %v199_v30, %v238_v59  ;;  %v1247_v63 = vsel %vm273_vm0, %v200_v31, %v240_v62  ;;  %vm922_vm0 = vcmask 261248  }
  0xa5   : > { %380 = vrot.lane.b32.xlu1 %v1181_v43, %s1098_s16  ;;  %382 = vrot.lane.b32.xlu0 %v1184_v45, %s1098_s16 }
  0xa9   : > { %384 = vrot.lane.b32.xlu1 %v1191_v47, %s1098_s16  ;;  %306 = vrot.lane.b32.xlu0 %v1210_v51, %s1097_s15 }
  0xad   : > { %308 = vrot.lane.b32.xlu1 %v1217_v54, %s1097_s15  ;;  %310 = vrot.lane.b32.xlu0 %v1220_v55, %s1097_s15 }
  0xb1   : > { %312 = vrot.lane.b32.xlu1 %v1227_v57, %s1097_s15  ;;  %314 = vrot.lane.b32.xlu0 %v1230_v58, %s1097_s15 }
  0xb5   : > { %316 = vrot.lane.b32.xlu1 %v1237_v60, %s1097_s15  ;;  %318 = vrot.lane.b32.xlu0 %v1240_v61, %s1097_s15 }
  0xb9   : > { %320 = vrot.lane.b32.xlu1 %v1247_v63, %s1097_s15  ;;  %354 = vrot.lane.b32.xlu0 %v1210_v51, %s1098_s16 }
  0xbd   : > { %356 = vrot.lane.b32.xlu1 %v1217_v54, %s1098_s16  ;;  %358 = vrot.lane.b32.xlu0 %v1220_v55, %s1098_s16 }
  0xc1   : > { %360 = vrot.lane.b32.xlu1 %v1227_v57, %s1098_s16  ;;  %362 = vrot.lane.b32.xlu0 %v1230_v58, %s1098_s16 }
  0xc5   : > { %364 = vrot.lane.b32.xlu1 %v1237_v60, %s1098_s16  ;;  %366 = vrot.lane.b32.xlu0 %v1240_v61, %s1098_s16 }
  0xc9   : > { %368 = vrot.lane.b32.xlu1 %v1247_v63, %s1098_s16 }
  0xfb   : > { %v323_v0 = vpop.permute.xlu0 %322 }
  0xff   : > { %v325_v2 = vpop.permute.xlu1 %324  ;;  %v327_v3 = vpop.permute.xlu0 %326 }
 0x103   : > { %v329_v5 = vpop.permute.xlu1 %328  ;;  %v331_v6 = vpop.permute.xlu0 %330 }
 0x107   : > { %v333_v8 = vpop.permute.xlu1 %332  ;;  %v335_v9 = vpop.permute.xlu0 %334 }
 0x10b   : > { %v337_v11 = vpop.permute.xlu1 %336  ;;  %v371_v12 = vpop.permute.xlu0 %370 }
 0x10c   : > { %v411_v13 = vsel %vm402_vm3, %v323_v0, %v371_v12 }
 0x10d   : > { %v1278_v14 = vsel %vm1270_vm4, %v411_v13, %v1156_v33  ;;  %v166_v13 = vand.u32 3, %v1267_v4 }
 0x10e   : > { %469 = vrot.lane.b32.xlu0 %v1278_v14, %s1099_s17 }
 0x10f   : > { %v373_v15 = vpop.permute.xlu1 %372  ;;  %v375_v16 = vpop.permute.xlu0 %374  ;;  %vm167_vm9 = vcmp.ge.s32.totalorder %v166_v13, 2  ;;  %vm168_vm10 = vcmp.lt.s32.totalorder %v166_v13, 3 }
 0x110   : > { %v412_v17 = vsel %vm402_vm3, %v325_v2, %v373_v15  ;;  %v413_v18 = vsel %vm402_vm3, %v327_v3, %v375_v16  ;;  %vm1600_vm12 = vmand %vm167_vm9, %vm168_vm10 }
 0x111   : > { %v1287_v19 = vsel %vm1270_vm4, %v412_v17, %v1164_v37  ;;  %v1292_v20 = vsel %vm1270_vm4, %v413_v18, %v1161_v35 }
 0x112   : > { %471 = vrot.lane.b32.xlu1 %v1287_v19, %s1099_s17  ;;  %473 = vrot.lane.b32.xlu0 %v1292_v20, %s1099_s17 }
 0x113   : > { %v377_v21 = vpop.permute.xlu1 %376  ;;  %v379_v22 = vpop.permute.xlu0 %378 }
 0x114   : > { %v414_v23 = vsel %vm402_vm3, %v329_v5, %v377_v21  ;;  %v415_v24 = vsel %vm402_vm3, %v331_v6, %v379_v22 }
 0x115   : > { %v1303_v25 = vsel %vm1270_vm4, %v414_v23, %v1171_v39  ;;  %v1308_v26 = vsel %vm1270_vm4, %v415_v24, %v1174_v41 }
 0x116   : > { %475 = vrot.lane.b32.xlu1 %v1303_v25, %s1099_s17  ;;  %477 = vrot.lane.b32.xlu0 %v1308_v26, %s1099_s17 }
 0x117   : > { %v381_v27 = vpop.permute.xlu1 %380  ;;  %v383_v28 = vpop.permute.xlu0 %382 }
 0x118   : > { %v416_v29 = vsel %vm402_vm3, %v333_v8, %v381_v27  ;;  %v417_v30 = vsel %vm402_vm3, %v335_v9, %v383_v28 }
 0x119   : > { %v1319_v31 = vsel %vm1270_vm4, %v416_v29, %v1181_v43  ;;  %v1324_v32 = vsel %vm1270_vm4, %v417_v30, %v1184_v45 }
 0x11a   : > { %479 = vrot.lane.b32.xlu1 %v1319_v31, %s1099_s17  ;;  %481 = vrot.lane.b32.xlu0 %v1324_v32, %s1099_s17 }
 0x11b   : > { %v385_v33 = vpop.permute.xlu1 %384  ;;  %v307_v34 = vpop.permute.xlu0 %306 }
 0x11c   : > { %v418_v35 = vsel %vm402_vm3, %v337_v11, %v385_v33 }
 0x11d   : > { %v1334_v36 = vsel %vm1270_vm4, %v418_v35, %v1191_v47 }
 0x11e   : > { %483 = vrot.lane.b32.xlu1 %v1334_v36, %s1099_s17  ;;  %517 = vrot.lane.b32.xlu0 %v1278_v14, %s1100_s18 }
 0x11f   : > { %v309_v37 = vpop.permute.xlu1 %308  ;;  %v311_v38 = vpop.permute.xlu0 %310 }
 0x122   : > { %519 = vrot.lane.b32.xlu1 %v1287_v19, %s1100_s18  ;;  %521 = vrot.lane.b32.xlu0 %v1292_v20, %s1100_s18 }
 0x123   : > { %v313_v39 = vpop.permute.xlu1 %312  ;;  %v315_v40 = vpop.permute.xlu0 %314 }
 0x126   : > { %523 = vrot.lane.b32.xlu1 %v1303_v25, %s1100_s18  ;;  %525 = vrot.lane.b32.xlu0 %v1308_v26, %s1100_s18 }
 0x127   : > { %v317_v41 = vpop.permute.xlu1 %316  ;;  %v319_v42 = vpop.permute.xlu0 %318 }
 0x12a   : > { %527 = vrot.lane.b32.xlu1 %v1319_v31, %s1100_s18  ;;  %529 = vrot.lane.b32.xlu0 %v1324_v32, %s1100_s18 }
 0x12b   : > { %v321_v43 = vpop.permute.xlu1 %320  ;;  %v355_v44 = vpop.permute.xlu0 %354 }
 0x12c   : > { %v403_v45 = vsel %vm402_vm3, %v307_v34, %v355_v44 }
 0x12d   : > { %v1356_v46 = vsel %vm1270_vm4, %v403_v45, %v1210_v51 }
 0x12e   : > { %531 = vrot.lane.b32.xlu1 %v1334_v36, %s1100_s18  ;;  %453 = vrot.lane.b32.xlu0 %v1356_v46, %s1099_s17 }
 0x12f   : > { %v357_v47 = vpop.permute.xlu1 %356  ;;  %v359_v48 = vpop.permute.xlu0 %358 }
 0x130   : > { %v404_v49 = vsel %vm402_vm3, %v309_v37, %v357_v47  ;;  %v405_v50 = vsel %vm402_vm3, %v311_v38, %v359_v48 }
 0x131   : > { %v1367_v52 = vsel %vm1270_vm4, %v404_v49, %v1217_v54  ;;  %v1372_v51 = vsel %vm1270_vm4, %v405_v50, %v1220_v55 }
 0x132   : > { %455 = vrot.lane.b32.xlu1 %v1367_v52, %s1099_s17  ;;  %457 = vrot.lane.b32.xlu0 %v1372_v51, %s1099_s17 }
 0x133   : > { %v361_v53 = vpop.permute.xlu1 %360  ;;  %v363_v56 = vpop.permute.xlu0 %362 }
 0x134   : > { %v406_v59 = vsel %vm402_vm3, %v313_v39, %v361_v53  ;;  %v407_v62 = vsel %vm402_vm3, %v315_v40, %v363_v56 }
 0x135   : > { %v1383_v54 = vsel %vm1270_vm4, %v406_v59, %v1227_v57  ;;  %v1388_v55 = vsel %vm1270_vm4, %v407_v62, %v1230_v58 }
 0x136   : > { %459 = vrot.lane.b32.xlu1 %v1383_v54, %s1099_s17  ;;  %461 = vrot.lane.b32.xlu0 %v1388_v55, %s1099_s17 }
 0x137   : > { %v365_v0 = vpop.permute.xlu1 %364  ;;  %v367_v1 = vpop.permute.xlu0 %366 }
 0x138   : > { %v408_v2 = vsel %vm402_vm3, %v317_v41, %v365_v0  ;;  %v409_v3 = vsel %vm402_vm3, %v319_v42, %v367_v1 }
 0x139   : > { %v1399_v57 = vsel %vm1270_vm4, %v408_v2, %v1237_v60  ;;  %v1404_v58 = vsel %vm1270_vm4, %v409_v3, %v1240_v61 }
 0x13a   : > { %463 = vrot.lane.b32.xlu1 %v1399_v57, %s1099_s17  ;;  %465 = vrot.lane.b32.xlu0 %v1404_v58, %s1099_s17 }
 0x13b   : > { %v369_v5 = vpop.permute.xlu1 %368 }
 0x13c   : > { %v410_v6 = vsel %vm402_vm3, %v321_v43, %v369_v5 }
 0x13d   : > { %v1414_v7 = vsel %vm1270_vm4, %v410_v6, %v1247_v63 }
 0x13e   : > { %467 = vrot.lane.b32.xlu1 %v1414_v7, %s1099_s17  ;;  %501 = vrot.lane.b32.xlu0 %v1356_v46, %s1100_s18 }
 0x142   : > { %503 = vrot.lane.b32.xlu1 %v1367_v52, %s1100_s18  ;;  %505 = vrot.lane.b32.xlu0 %v1372_v51, %s1100_s18 }
 0x146   : > { %507 = vrot.lane.b32.xlu1 %v1383_v54, %s1100_s18  ;;  %509 = vrot.lane.b32.xlu0 %v1388_v55, %s1100_s18 }
 0x14a   : > { %511 = vrot.lane.b32.xlu1 %v1399_v57, %s1100_s18  ;;  %513 = vrot.lane.b32.xlu0 %v1404_v58, %s1100_s18 }
 0x14e   : > { %515 = vrot.lane.b32.xlu1 %v1414_v7, %s1100_s18 }
 0x180   : > { %v470_v60 = vpop.permute.xlu0 %469 }
 0x184   : > { %v472_v61 = vpop.permute.xlu1 %471  ;;  %v474_v63 = vpop.permute.xlu0 %473 }
 0x188   : > { %v476_v8 = vpop.permute.xlu1 %475  ;;  %v478_v9 = vpop.permute.xlu0 %477 }
 0x18c   : > { %v480_v11 = vpop.permute.xlu1 %479  ;;  %v482_v12 = vpop.permute.xlu0 %481 }
 0x190   : > { %v484_v15 = vpop.permute.xlu1 %483  ;;  %v518_v16 = vpop.permute.xlu0 %517 }
 0x191   : > { %v558_v17 = vsel %vm549_vm7, %v470_v60, %v518_v16 }
 0x192   : > { %v1443_v18 = vsel %vm1435_vm8, %v558_v17, %v1278_v14 }
 0x193   : > { %616 = vrot.lane.b32.xlu0 %v1443_v18, %s1101_s19 }
 0x194   : > { %v520_v21 = vpop.permute.xlu1 %519  ;;  %v522_v22 = vpop.permute.xlu0 %521 }
 0x195   : > { %v559_v23 = vsel %vm549_vm7, %v472_v61, %v520_v21  ;;  %v560_v24 = vsel %vm549_vm7, %v474_v63, %v522_v22 }
 0x196   : > { %v1452_v27 = vsel %vm1435_vm8, %v559_v23, %v1287_v19  ;;  %v1457_v14 = vsel %vm1435_vm8, %v560_v24, %v1292_v20 }
 0x197   : > { %618 = vrot.lane.b32.xlu1 %v1452_v27, %s1101_s19  ;;  %620 = vrot.lane.b32.xlu0 %v1457_v14, %s1101_s19 }
 0x198   : > { %v524_v28 = vpop.permute.xlu1 %523  ;;  %v526_v29 = vpop.permute.xlu0 %525 }
 0x199   : > { %v561_v30 = vsel %vm549_vm7, %v476_v8, %v524_v28  ;;  %v562_v33 = vsel %vm549_vm7, %v478_v9, %v526_v29 }
 0x19a   : > { %v1468_v19 = vsel %vm1435_vm8, %v561_v30, %v1303_v25  ;;  %v1473_v20 = vsel %vm1435_vm8, %v562_v33, %v1308_v26 }
 0x19b   : > { %622 = vrot.lane.b32.xlu1 %v1468_v19, %s1101_s19  ;;  %624 = vrot.lane.b32.xlu0 %v1473_v20, %s1101_s19 }
 0x19c   : > { %v528_v34 = vpop.permute.xlu1 %527  ;;  %v530_v35 = vpop.permute.xlu0 %529 }
 0x19d   : > { %v563_v37 = vsel %vm549_vm7, %v480_v11, %v528_v34  ;;  %v564_v38 = vsel %vm549_vm7, %v482_v12, %v530_v35 }
 0x19e   : > { %v1484_v25 = vsel %vm1435_vm8, %v563_v37, %v1319_v31  ;;  %v1489_v26 = vsel %vm1435_vm8, %v564_v38, %v1324_v32 }
 0x19f   : > { %626 = vrot.lane.b32.xlu1 %v1484_v25, %s1101_s19  ;;  %628 = vrot.lane.b32.xlu0 %v1489_v26, %s1101_s19 }
 0x1a0   : > { %v532_v39 = vpop.permute.xlu1 %531  ;;  %v454_v40 = vpop.permute.xlu0 %453 }
 0x1a1   : > { %v565_v41 = vsel %vm549_vm7, %v484_v15, %v532_v39 }
 0x1a2   : > { %v1499_v31 = vsel %vm1435_vm8, %v565_v41, %v1334_v36 }
 0x1a3   : > { %630 = vrot.lane.b32.xlu1 %v1499_v31, %s1101_s19  ;;  %664 = vrot.lane.b32.xlu0 %v1443_v18, %s1102_s20 }
 0x1a4   : > { %v456_v32 = vpop.permute.xlu1 %455  ;;  %v458_v42 = vpop.permute.xlu0 %457 }
 0x1a7   : > { %666 = vrot.lane.b32.xlu1 %v1452_v27, %s1102_s20  ;;  %668 = vrot.lane.b32.xlu0 %v1457_v14, %s1102_s20 }
 0x1a8   : > { %v460_v43 = vpop.permute.xlu1 %459  ;;  %v462_v44 = vpop.permute.xlu0 %461 }
 0x1ab   : > { %670 = vrot.lane.b32.xlu1 %v1468_v19, %s1102_s20  ;;  %672 = vrot.lane.b32.xlu0 %v1473_v20, %s1102_s20 }
 0x1ac   : > { %v464_v36 = vpop.permute.xlu1 %463  ;;  %v466_v45 = vpop.permute.xlu0 %465 }
 0x1af   : > { %674 = vrot.lane.b32.xlu1 %v1484_v25, %s1102_s20  ;;  %676 = vrot.lane.b32.xlu0 %v1489_v26, %s1102_s20 }
 0x1b0   : > { %v468_v47 = vpop.permute.xlu1 %467  ;;  %v502_v48 = vpop.permute.xlu0 %501 }
 0x1b1   : > { %v550_v49 = vsel %vm549_vm7, %v454_v40, %v502_v48 }
 0x1b2   : > { %v1521_v50 = vsel %vm1435_vm8, %v550_v49, %v1356_v46 }
 0x1b3   : > { %678 = vrot.lane.b32.xlu1 %v1499_v31, %s1102_s20  ;;  %600 = vrot.lane.b32.xlu0 %v1521_v50, %s1101_s19 }
 0x1b4   : > { %v504_v53 = vpop.permute.xlu1 %503  ;;  %v506_v56 = vpop.permute.xlu0 %505 }
 0x1b5   : > { %v551_v59 = vsel %vm549_vm7, %v456_v32, %v504_v53  ;;  %v552_v62 = vsel %vm549_vm7, %v458_v42, %v506_v56 }
 0x1b6   : > { %v1532_v0 = vsel %vm1435_vm8, %v551_v59, %v1367_v52  ;;  %v1537_v46 = vsel %vm1435_vm8, %v552_v62, %v1372_v51 }
 0x1b7   : > { %602 = vrot.lane.b32.xlu1 %v1532_v0, %s1101_s19  ;;  %604 = vrot.lane.b32.xlu0 %v1537_v46, %s1101_s19 }
 0x1b8   : > { %v508_v1 = vpop.permute.xlu1 %507  ;;  %v510_v2 = vpop.permute.xlu0 %509 }
 0x1b9   : > { %v553_v3 = vsel %vm549_vm7, %v460_v43, %v508_v1  ;;  %v554_v5 = vsel %vm549_vm7, %v462_v44, %v510_v2 }
 0x1ba   : > { %v1548_v52 = vsel %vm1435_vm8, %v553_v3, %v1383_v54  ;;  %v1553_v51 = vsel %vm1435_vm8, %v554_v5, %v1388_v55 }
 0x1bb   : > { %606 = vrot.lane.b32.xlu1 %v1548_v52, %s1101_s19  ;;  %608 = vrot.lane.b32.xlu0 %v1553_v51, %s1101_s19 }
 0x1bc   : > { %v512_v6 = vpop.permute.xlu1 %511  ;;  %v514_v60 = vpop.permute.xlu0 %513 }
 0x1bd   : > { %v555_v61 = vsel %vm549_vm7, %v464_v36, %v512_v6  ;;  %v556_v63 = vsel %vm549_vm7, %v466_v45, %v514_v60 }
 0x1be   : > { %v1564_v54 = vsel %vm1435_vm8, %v555_v61, %v1399_v57  ;;  %v1569_v55 = vsel %vm1435_vm8, %v556_v63, %v1404_v58 }
 0x1bf   : > { %610 = vrot.lane.b32.xlu1 %v1564_v54, %s1101_s19  ;;  %612 = vrot.lane.b32.xlu0 %v1569_v55, %s1101_s19 }
 0x1c0   : > { %v516_v8 = vpop.permute.xlu1 %515 }
 0x1c1   : > { %v557_v9 = vsel %vm549_vm7, %v468_v47, %v516_v8 }
 0x1c2   : > { %v1579_v10 = vsel %vm1435_vm8, %v557_v9, %v1414_v7 }
 0x1c3   : > { %614 = vrot.lane.b32.xlu1 %v1579_v10, %s1101_s19  ;;  %648 = vrot.lane.b32.xlu0 %v1521_v50, %s1102_s20 }
 0x1c7   : > { %650 = vrot.lane.b32.xlu1 %v1532_v0, %s1102_s20  ;;  %652 = vrot.lane.b32.xlu0 %v1537_v46, %s1102_s20 }
 0x1cb   : > { %654 = vrot.lane.b32.xlu1 %v1548_v52, %s1102_s20  ;;  %656 = vrot.lane.b32.xlu0 %v1553_v51, %s1102_s20 }
 0x1cf   : > { %658 = vrot.lane.b32.xlu1 %v1564_v54, %s1102_s20  ;;  %660 = vrot.lane.b32.xlu0 %v1569_v55, %s1102_s20 }
 0x1d3   : > { %662 = vrot.lane.b32.xlu1 %v1579_v10, %s1102_s20 }
 0x205   : > { %v617_v57 = vpop.permute.xlu0 %616 }
 0x209   : > { %v619_v58 = vpop.permute.xlu1 %618  ;;  %v621_v7 = vpop.permute.xlu0 %620 }
 0x20d   : > { %v623_v11 = vpop.permute.xlu1 %622  ;;  %v625_v12 = vpop.permute.xlu0 %624 }
 0x211   : > { %v627_v15 = vpop.permute.xlu1 %626  ;;  %v629_v16 = vpop.permute.xlu0 %628 }
 0x215   : > { %v631_v21 = vpop.permute.xlu1 %630  ;;  %v665_v22 = vpop.permute.xlu0 %664 }
 0x216   : > { %v705_v23 = vsel %vm696_vm11, %v617_v57, %v665_v22 }
 0x217   : > { %v1608_v24 = vsel %vm1600_vm12, %v705_v23, %v1443_v18 }
 0x218   : > { %763 = vrot.lane.b32.xlu0 %v1608_v24, %s1101_s19 }
 0x219   : > { %v667_v28 = vpop.permute.xlu1 %666  ;;  %v669_v29 = vpop.permute.xlu0 %668 }
 0x21a   : > { %v706_v30 = vsel %vm696_vm11, %v619_v58, %v667_v28  ;;  %v707_v33 = vsel %vm696_vm11, %v621_v7, %v669_v29  ;;  %v170_v28 = vand.u32 1, %v1267_v4 }
 0x21b   : > { %v1617_v34 = vsel %vm1600_vm12, %v706_v30, %v1452_v27  ;;  %v1622_v35 = vsel %vm1600_vm12, %v707_v33, %v1457_v14 }
 0x21c   : > { %765 = vrot.lane.b32.xlu1 %v1617_v34, %s1101_s19  ;;  %767 = vrot.lane.b32.xlu0 %v1622_v35, %s1101_s19  ;;  %vm1765_vm13 = vcmp.eq.s32.totalorder %v170_v28, 1  ;;  %vm172_vm14 = vcmp.eq.s32.totalorder %v170_v28, 0 }
 0x21d   : > { %v671_v18 = vpop.permute.xlu1 %670  ;;  %v673_v37 = vpop.permute.xlu0 %672 }
 0x21e   : > { %v708_v38 = vsel %vm696_vm11, %v623_v11, %v671_v18  ;;  %v709_v39 = vsel %vm696_vm11, %v625_v12, %v673_v37 }
 0x21f   : > { %v1633_v27 = vsel %vm1600_vm12, %v708_v38, %v1468_v19  ;;  %v1638_v14 = vsel %vm1600_vm12, %v709_v39, %v1473_v20  ;;  %v1103_v39 = vmov 0.5  }
 0x220   : > { %769 = vrot.lane.b32.xlu1 %v1633_v27, %s1101_s19  ;;  %771 = vrot.lane.b32.xlu0 %v1638_v14, %s1101_s19 }
 0x221   : > { %v675_v40 = vpop.permute.xlu1 %674  ;;  %v677_v41 = vpop.permute.xlu0 %676 }
 0x222   : > { %v710_v32 = vsel %vm696_vm11, %v627_v15, %v675_v40  ;;  %v711_v42 = vsel %vm696_vm11, %v629_v16, %v677_v41  ;;  %v1773_v40 = vsel %vm172_vm14, -0.5, %v1103_v39 }
 0x223   : > { %v1649_v19 = vsel %vm1600_vm12, %v710_v32, %v1484_v25  ;;  %v1654_v20 = vsel %vm1600_vm12, %v711_v42, %v1489_v26 }
 0x224   : > { %773 = vrot.lane.b32.xlu1 %v1649_v19, %s1101_s19  ;;  %775 = vrot.lane.b32.xlu0 %v1654_v20, %s1101_s19 }
 0x225   : > { %v679_v43 = vpop.permute.xlu1 %678  ;;  %v601_v44 = vpop.permute.xlu0 %600 }
 0x226   : > { %v712_v36 = vsel %vm696_vm11, %v631_v21, %v679_v43 }
 0x227   : > { %v1664_v25 = vsel %vm1600_vm12, %v712_v36, %v1499_v31 }
 0x228   : > { %777 = vrot.lane.b32.xlu1 %v1664_v25, %s1101_s19  ;;  %811 = vrot.lane.b32.xlu0 %v1608_v24, %s1102_s20 }
 0x229   : > { %v603_v26 = vpop.permute.xlu1 %602  ;;  %v605_v45 = vpop.permute.xlu0 %604 }
 0x22c   : > { %813 = vrot.lane.b32.xlu1 %v1617_v34, %s1102_s20  ;;  %815 = vrot.lane.b32.xlu0 %v1622_v35, %s1102_s20 }
 0x22d   : > { %v607_v47 = vpop.permute.xlu1 %606  ;;  %v609_v48 = vpop.permute.xlu0 %608 }
 0x230   : > { %817 = vrot.lane.b32.xlu1 %v1633_v27, %s1102_s20  ;;  %819 = vrot.lane.b32.xlu0 %v1638_v14, %s1102_s20 }
 0x231   : > { %v611_v31 = vpop.permute.xlu1 %610  ;;  %v613_v49 = vpop.permute.xlu0 %612 }
 0x234   : > { %821 = vrot.lane.b32.xlu1 %v1649_v19, %s1102_s20  ;;  %823 = vrot.lane.b32.xlu0 %v1654_v20, %s1102_s20 }
 0x235   : > { %v615_v53 = vpop.permute.xlu1 %614  ;;  %v649_v56 = vpop.permute.xlu0 %648 }
 0x236   : > { %v697_v59 = vsel %vm696_vm11, %v601_v44, %v649_v56 }
 0x237   : > { %v1686_v62 = vsel %vm1600_vm12, %v697_v59, %v1521_v50 }
 0x238   : > { %825 = vrot.lane.b32.xlu1 %v1664_v25, %s1102_s20  ;;  %747 = vrot.lane.b32.xlu0 %v1686_v62, %s1101_s19 }
 0x239   : > { %v651_v1 = vpop.permute.xlu1 %650  ;;  %v653_v2 = vpop.permute.xlu0 %652 }
 0x23a   : > { %v698_v3 = vsel %vm696_vm11, %v603_v26, %v651_v1  ;;  %v699_v5 = vsel %vm696_vm11, %v605_v45, %v653_v2 }
 0x23b   : > { %v1697_v6 = vsel %vm1600_vm12, %v698_v3, %v1532_v0  ;;  %v1702_v50 = vsel %vm1600_vm12, %v699_v5, %v1537_v46 }
 0x23c   : > { %749 = vrot.lane.b32.xlu1 %v1697_v6, %s1101_s19  ;;  %751 = vrot.lane.b32.xlu0 %v1702_v50, %s1101_s19 }
 0x23d   : > { %v655_v60 = vpop.permute.xlu1 %654  ;;  %v657_v61 = vpop.permute.xlu0 %656 }
 0x23e   : > { %v700_v63 = vsel %vm696_vm11, %v607_v47, %v655_v60  ;;  %v701_v8 = vsel %vm696_vm11, %v609_v48, %v657_v61 }
 0x23f   : > { %v1713_v0 = vsel %vm1600_vm12, %v700_v63, %v1548_v52  ;;  %v1718_v46 = vsel %vm1600_vm12, %v701_v8, %v1553_v51 }
 0x240   : > { %753 = vrot.lane.b32.xlu1 %v1713_v0, %s1101_s19  ;;  %755 = vrot.lane.b32.xlu0 %v1718_v46, %s1101_s19 }
 0x241   : > { %v659_v9 = vpop.permute.xlu1 %658  ;;  %v661_v57 = vpop.permute.xlu0 %660 }
 0x242   : > { %v702_v58 = vsel %vm696_vm11, %v611_v31, %v659_v9  ;;  %v703_v7 = vsel %vm696_vm11, %v613_v49, %v661_v57 }
 0x243   : > { %v1729_v52 = vsel %vm1600_vm12, %v702_v58, %v1564_v54  ;;  %v1734_v51 = vsel %vm1600_vm12, %v703_v7, %v1569_v55 }
 0x244   : > { %757 = vrot.lane.b32.xlu1 %v1729_v52, %s1101_s19  ;;  %759 = vrot.lane.b32.xlu0 %v1734_v51, %s1101_s19 }
 0x245   : > { %v663_v11 = vpop.permute.xlu1 %662 }
 0x246   : > { %v704_v12 = vsel %vm696_vm11, %v615_v53, %v663_v11 }
 0x247   : > { %v1744_v13 = vsel %vm1600_vm12, %v704_v12, %v1579_v10 }
 0x248   : > { %761 = vrot.lane.b32.xlu1 %v1744_v13, %s1101_s19  ;;  %795 = vrot.lane.b32.xlu0 %v1686_v62, %s1102_s20 }
 0x24c   : > { %797 = vrot.lane.b32.xlu1 %v1697_v6, %s1102_s20  ;;  %799 = vrot.lane.b32.xlu0 %v1702_v50, %s1102_s20 }
 0x250   : > { %801 = vrot.lane.b32.xlu1 %v1713_v0, %s1102_s20  ;;  %803 = vrot.lane.b32.xlu0 %v1718_v46, %s1102_s20 }
 0x254   : > { %805 = vrot.lane.b32.xlu1 %v1729_v52, %s1102_s20  ;;  %807 = vrot.lane.b32.xlu0 %v1734_v51, %s1102_s20 }
 0x258   : > { %809 = vrot.lane.b32.xlu1 %v1744_v13, %s1102_s20 }
 0x28a   : > { %v764_v54 = vpop.permute.xlu0 %763 }
 0x28e   : > { %v766_v55 = vpop.permute.xlu1 %765  ;;  %v768_v10 = vpop.permute.xlu0 %767 }
 0x292   : > { %v770_v15 = vpop.permute.xlu1 %769  ;;  %v772_v16 = vpop.permute.xlu0 %771 }
 0x296   : > { %v774_v17 = vpop.permute.xlu1 %773  ;;  %v776_v21 = vpop.permute.xlu0 %775 }
 0x29a   : > { %v778_v22 = vpop.permute.xlu1 %777  ;;  %v812_v23 = vpop.permute.xlu0 %811 }
 0x29b   : > { %v851_v18 = vsel %vm696_vm11, %v764_v54, %v812_v23 }
 0x29c   : > { %v869_v37 = vsel %vm1765_vm13, %v851_v18, %v1608_v24 }
 0x29d   : > { %v889_v44 = vmul.f32 0.5, %v869_v37 }
 0x29e   : > { %v814_v29 = vpop.permute.xlu1 %813  ;;  %v816_v30 = vpop.permute.xlu0 %815 }
 0x29f   : > { %v852_v4 = vsel %vm696_vm11, %v766_v55, %v814_v29  ;;  %v853_v32 = vsel %vm696_vm11, %v768_v10, %v816_v30 }
 0x2a0   : > { %v870_v24 = vsel %vm1765_vm13, %v852_v4, %v1617_v34  ;;  %v871_v26 = vsel %vm1765_vm13, %v853_v32, %v1622_v35 }
 0x2a1   : > { %v890_v56 = vmul.f32 0.5, %v870_v24  ;;  %v891_v59 = vmul.f32 0.5, %v871_v26 }
 0x2a2   : > { %v818_v38 = vpop.permute.xlu1 %817  ;;  %v820_v41 = vpop.permute.xlu0 %819 }
 0x2a3   : > { %v855_v42 = vsel %vm696_vm11, %v772_v16, %v820_v41  ;;  %v854_v48 = vsel %vm696_vm11, %v770_v15, %v818_v38 }
 0x2a4   : > { %v873_v43 = vsel %vm1765_vm13, %v855_v42, %v1638_v14  ;;  %v872_v2 = vsel %vm1765_vm13, %v854_v48, %v1633_v27 }
 0x2a5   : > { %v893_v36 = vmul.f32 %v873_v43, %v1773_v40  ;;  %v892_v63 = vmul.f32 0.5, %v872_v2 }
 0x2a6   : > { %v822_v45 = vpop.permute.xlu1 %821  ;;  %v824_v47 = vpop.permute.xlu0 %823 }
 0x2a7   : > { %v897_v31 = vadd.f32 %v893_v36, %v889_v44  ;;  %v856_v49 = vsel %vm696_vm11, %v774_v17, %v822_v45  ;;  %v857_v14 = vsel %vm696_vm11, %v776_v21, %v824_v47 }
 0x2a8   : > { %v874_v53 = vsel %vm1765_vm13, %v856_v49, %v1649_v19  ;;  %v875_v34 = vsel %vm1765_vm13, %v857_v14, %v1654_v20 }
 0x2a9   : > { %v894_v35 = vmul.f32 %v874_v53, %v1773_v40  ;;  %v895_v1 = vmul.f32 %v875_v34, %v1773_v40  ;;  %910 = vrot.lane.b32.xlu0 %v897_v31, %s1104_s21 }
 0x2aa   : > { %v826_v3 = vpop.permute.xlu1 %825  ;;  %v748_v5 = vpop.permute.xlu0 %747 }
 0x2ab   : > { %v898_v60 = vadd.f32 %v894_v35, %v890_v56  ;;  %v899_v19 = vadd.f32 %v895_v1, %v891_v59  ;;  %v858_v61 = vsel %vm696_vm11, %v778_v22, %v826_v3 }
 0x2ac   : > { %v876_v20 = vsel %vm1765_vm13, %v858_v61, %v1664_v25 }
 0x2ad   : > { %v896_v8 = vmul.f32 %v876_v20, %v1773_v40  ;;  %912 = vrot.lane.b32.xlu1 %v898_v60, %s1104_s21  ;;  %914 = vrot.lane.b32.xlu0 %v899_v19, %s1104_s21 }
 0x2ae   : > { %v750_v9 = vpop.permute.xlu1 %749  ;;  %v752_v57 = vpop.permute.xlu0 %751 }
 0x2af   : > { %v900_v58 = vadd.f32 %v896_v8, %v892_v63 }
 0x2b1   : > { %916 = vrot.lane.b32.xlu1 %v900_v58, %s1104_s21 }
 0x2b2   : > { %v754_v27 = vpop.permute.xlu1 %753  ;;  %v756_v7 = vpop.permute.xlu0 %755 }
 0x2b6   : > { %v758_v11 = vpop.permute.xlu1 %757  ;;  %v760_v12 = vpop.permute.xlu0 %759 }
 0x2ba   : > { %v762_v54 = vpop.permute.xlu1 %761  ;;  %v796_v55 = vpop.permute.xlu0 %795 }
 0x2bb   : > { %v843_v25 = vsel %vm696_vm11, %v748_v5, %v796_v55 }
 0x2bc   : > { %v861_v16 = vsel %vm1765_vm13, %v843_v25, %v1686_v62 }
 0x2bd   : > { %v877_v30 = vmul.f32 0.5, %v861_v16 }
 0x2be   : > { %v798_v10 = vpop.permute.xlu1 %797  ;;  %v800_v15 = vpop.permute.xlu0 %799 }
 0x2bf   : > { %v844_v22 = vsel %vm696_vm11, %v750_v9, %v798_v10  ;;  %v845_v23 = vsel %vm696_vm11, %v752_v57, %v800_v15 }
 0x2c0   : > { %v862_v62 = vsel %vm1765_vm13, %v844_v22, %v1697_v6  ;;  %v863_v37 = vsel %vm1765_vm13, %v845_v23, %v1702_v50 }
 0x2c1   : > { %v878_v42 = vmul.f32 0.5, %v862_v62  ;;  %v879_v43 = vmul.f32 0.5, %v863_v37 }
 0x2c2   : > { %v802_v17 = vpop.permute.xlu1 %801  ;;  %v804_v21 = vpop.permute.xlu0 %803 }
 0x2c3   : > { %v847_v28 = vsel %vm696_vm11, %v756_v7, %v804_v21 }
 0x2c4   : > { %v865_v29 = vsel %vm1765_vm13, %v847_v28, %v1718_v46  ;;  %v846_v46 = vsel %vm696_vm11, %v754_v27, %v802_v17 }
 0x2c5   : > { %v881_v18 = vmul.f32 %v865_v29, %v1773_v40  ;;  %v864_v24 = vsel %vm1765_vm13, %v846_v46, %v1713_v0 }
 0x2c6   : > { %v806_v38 = vpop.permute.xlu1 %805  ;;  %v808_v39 = vpop.permute.xlu0 %807  ;;  %v880_v48 = vmul.f32 0.5, %v864_v24 }
 0x2c7   : > { %v885_v41 = vadd.f32 %v881_v18, %v877_v30  ;;  %v848_v4 = vsel %vm696_vm11, %v758_v11, %v806_v38  ;;  %v849_v6 = vsel %vm696_vm11, %v760_v12, %v808_v39 }
 0x2c8   : > { %v866_v50 = vsel %vm1765_vm13, %v848_v4, %v1729_v52  ;;  %v867_v32 = vsel %vm1765_vm13, %v849_v6, %v1734_v51 }
 0x2c9   : > { %v882_v44 = vmul.f32 %v866_v50, %v1773_v40  ;;  %v883_v36 = vmul.f32 %v867_v32, %v1773_v40  ;;  %902 = vst.msk [vmem:[%s1828_s25] sm:$0xff] %vm901_vm15, %v885_v41 }
 0x2ca   : > { %v810_v52 = vpop.permute.xlu1 %809 }
 0x2cb   : > { %v886_v26 = vadd.f32 %v882_v44, %v878_v42  ;;  %v887_v45 = vadd.f32 %v883_v36, %v879_v43  ;;  %v850_v51 = vsel %vm696_vm11, %v762_v54, %v810_v52 }
 0x2cc   : > { %v868_v47 = vsel %vm1765_vm13, %v850_v51, %v1744_v13 }
 0x2cd   : > { %v884_v31 = vmul.f32 %v868_v47, %v1773_v40  ;;  %903 = vst.msk [vmem:[%s1828_s25 + $0x8] sm:$0xff] %vm901_vm15, %v886_v26  ;;  %904 = vst.msk [vmem:[%s1828_s25 + $0x10] sm:$0xff] %vm901_vm15, %v887_v45 }
 0x2cf   : > { %v888_v0 = vadd.f32 %v884_v31, %v880_v48 }
 0x2d1   : > { %905 = vst.msk [vmem:[%s1828_s25 + $0x18] sm:$0xff] %vm901_vm15, %v888_v0 }
 0x31b   : > { %v911_v49 = vpop.permute.xlu0 %910 }
 0x31c   : > { %923 = vst.msk [vmem:[%s1828_s25] sm:$0xff] %vm922_vm0, %v911_v49 }
 0x31f   : > { %v913_v14 = vpop.permute.xlu1 %912  ;;  %v915_v53 = vpop.permute.xlu0 %914 }
 0x320   : > { %924 = vst.msk [vmem:[%s1828_s25 + $0x8] sm:$0xff] %vm922_vm0, %v913_v14  ;;  %925 = vst.msk [vmem:[%s1828_s25 + $0x10] sm:$0xff] %vm922_vm0, %v915_v53 }
 0x323   : > { %v917_v33 = vpop.permute.xlu1 %916 }
 0x324   : > { %926 = vst.msk [vmem:[%s1828_s25 + $0x18] sm:$0xff] %vm922_vm0, %v917_v33 }
 0x325 PF: > { %s11_s8 = sadd.s32 1, %s1094_s8   ;;  %s1880_s6 = smov %s1090_s7 }
 0x326   : > { %p8_p5 = scmp.ge.s32.totalorder %s11_s8, 4   ;;  %s1881_s7 = smov %s1883_s9 }
 0x328   :  { %10 = sbr.rel (!%p8_p5) target bundleno = 2 (0x2), region = 57 }

</bundles_post_ra>
